<compile_context>
chip_gen: v7x
topology: tpu7x:2x2x1
jax: 0.10.0
libtpu: 0.0.40
codegen_flags: <defaults>
</compile_context>

<pallas_src>
import math
import functools

import jax
import jax.numpy as jnp
from jax import lax
from jax.experimental import pallas as pl
from jax.experimental.pallas import tpu as pltpu


def _round_up(v, m):
    return ((v + m - 1) // m) * m


def _vmem_caps():
    """Returns (pipeline buffer budget bytes, scoped vmem limit bytes)."""
    try:
        cap = int(pltpu.get_tpu_info().vmem_capacity_bytes)
    except Exception:
        cap = 64 << 20  # conservative default (v7x per-TensorCore VMEM)
    budget = min(cap // 4, 20 << 20)   # what we let the double-buffers use
    limit = min(cap // 2, 32 << 20)    # scoped limit requested from Mosaic
    return budget, limit


# ----------------------------------------------------------------------------
# Kernels
# ----------------------------------------------------------------------------
def _stdlinear_resident_kernel(x_ref, w_ref, b_ref, o_ref, *, scale):
    # x_ref: (tm, K)  w_ref: (N, K)  b_ref: (1, N)  o_ref: (tm, N)
    # Whole weight is VMEM-resident (constant index_map): single-shot matmul.
    acc = lax.dot_general(
        x_ref[...],
        w_ref[...],
        dimension_numbers=(((1,), (1,)), ((), ())),   # trans_b: (tm,K) x (N,K)^T
        preferred_element_type=jnp.float32,
    )
    o_ref[...] = ((acc + b_ref[...]) * scale).astype(o_ref.dtype)


def _stdlinear_tiled_kernel(x_ref, w_ref, b_ref, o_ref, acc_ref, *, scale):
    # x_ref: (tm, tk)  w_ref: (tn, tk)  b_ref: (1, tn)
    # o_ref: (tm, tn)  acc_ref: (tm, tn) f32 scratch, resident across the K axis
    k = pl.program_id(2)

    @pl.when(k == 0)
    def _():
        acc_ref[...] = jnp.zeros_like(acc_ref)

    acc_ref[...] += lax.dot_general(
        x_ref[...],
        w_ref[...],
        dimension_numbers=(((1,), (1,)), ((), ())),   # trans_b, no W relayout
        preferred_element_type=jnp.float32,
    )

    @pl.when(k == pl.num_programs(2) - 1)
    def _():
        o_ref[...] = ((acc_ref[...] + b_ref[...]) * scale).astype(o_ref.dtype)


# ----------------------------------------------------------------------------
# Wrapper
# ----------------------------------------------------------------------------
def std_linear(x, weight, bias=None, *, compute_dtype=jnp.bfloat16,
               force_tiled=False, tm=512, tn=512, tk=2048):
    """y = (x @ weight.T + bias) / sqrt(in_features), computed in Pallas.

    x:      (..., K)
    weight: (N, K)   (PyTorch nn.Linear layout)
    bias:   (N,) or None
    """
    K = x.shape[-1]
    N, Kw = weight.shape
    assert Kw == K, "weight must be (out_features, in_features)"
    lead_shape = x.shape[:-1]
    out_dtype = x.dtype

    x2d = x.reshape(-1, K)
    M = x2d.shape[0]
    scale = 1.0 / math.sqrt(K)          # scale uses the *original* in_features

    if bias is None:
        bias = jnp.zeros((N,), dtype=jnp.float32)

    # One-time lane-alignment padding (exact: zero columns add nothing to the
    # contraction; padded output columns are sliced off at the end).
    K_pad = _round_up(K, 128)
    N_pad = _round_up(N, 128)
    if K_pad != K:
        x2d = jnp.pad(x2d, ((0, 0), (0, K_pad - K)))
        weight = jnp.pad(weight, ((0, 0), (0, K_pad - K)))
    if N_pad != N:
        weight = jnp.pad(weight, ((0, N_pad - N), (0, 0)))
        bias = jnp.pad(bias, ((0, N_pad - N),))

    # bf16 streams from HBM; f32 accumulate inside the kernel.
    x2d = x2d.astype(compute_dtype)
    weight = weight.astype(compute_dtype)
    bias2d = bias.astype(jnp.float32).reshape(1, N_pad)

    in_isz = jnp.dtype(compute_dtype).itemsize
    out_isz = jnp.dtype(out_dtype).itemsize
    budget, vmem_limit = _vmem_caps()

    # Row tile: multiple of 16 for bf16 sublane packing. Ragged M tail is
    # handled by the grid (Pallas masks out-of-bounds stores; K tiling is exact
    # after padding, so garbage rows never contaminate valid rows).
    tm = min(tm, _round_up(M, 16))

    # ------------------------------------------------------------------
    # Weight-resident fast path: weight DMA'd from HBM exactly once.
    # ------------------------------------------------------------------
    w_bytes = N_pad * K_pad * in_isz
    if (not force_tiled) and w_bytes <= min(budget // 3, 8 << 20):
        def _fits(tm_):
            need = (2 * w_bytes                       # weight buffers
                    + 2 * tm_ * K_pad * in_isz        # x double buffer
                    + 2 * tm_ * N_pad * out_isz       # out double buffer
                    + 2 * N_pad * 4)                  # bias
            return need <= budget

        while tm > 16 and not _fits(tm):
            tm = _round_up(tm // 2, 16)

        grid = (pl.cdiv(M, tm),)
        kernel = functools.partial(_stdlinear_resident_kernel, scale=scale)
        cost = pl.CostEstimate(
            flops=2 * M * N_pad * K_pad,
            transcendentals=0,
            bytes_accessed=(M * K_pad * in_isz + w_bytes
                            + M * N_pad * out_isz + N_pad * 4),
        )
        out = pl.pallas_call(
            kernel,
            out_shape=jax.ShapeDtypeStruct((M, N_pad), out_dtype),
            grid_spec=pltpu.PrefetchScalarGridSpec(
                num_scalar_prefetch=0,
                grid=grid,
                in_specs=[
                    pl.BlockSpec((tm, K_pad), lambda i: (i, 0)),     # x row tile
                    pl.BlockSpec((N_pad, K_pad), lambda i: (0, 0)),  # resident W
                    pl.BlockSpec((1, N_pad), lambda i: (0, 0)),      # bias
                ],
                out_specs=pl.BlockSpec((tm, N_pad), lambda i: (i, 0)),
            ),
            compiler_params=pltpu.CompilerParams(
                dimension_semantics=("parallel",),
                vmem_limit_bytes=vmem_limit,
            ),
            cost_estimate=cost,
        )(x2d, weight, bias2d)
        return out[:, :N].reshape(*lead_shape, N)

    # ------------------------------------------------------------------
    # Tiled path: 3-D grid with K innermost and an f32 VMEM accumulator.
    # ------------------------------------------------------------------
    m_tiles = pl.cdiv(M, tm)
    w_buf = 3 if m_tiles == 1 else 2      # deeper weight pipeline when M-small

    def _step_bytes(tm_, tn_, tk_):
        return (2 * tm_ * tk_ * in_isz        # x double buffer
                + w_buf * tn_ * tk_ * in_isz  # weight buffers
                + 2 * tm_ * tn_ * out_isz     # out double buffer
                + tm_ * tn_ * 4               # f32 accumulator scratch
                + 2 * tn_ * 4)                # bias

    tn_cands = [c for c in (512, 256, 128) if c <= max(tn, 128) and N_pad % c == 0]
    tk_cands = [c for c in (2048, 1024, 512, 256, 128)
                if c <= max(tk, 128) and K_pad % c == 0]

    sel = None
    for tn_ in tn_cands:
        for tk_ in tk_cands:
            if _step_bytes(tm, tn_, tk_) <= budget:
                sel = (tn_, tk_)
                break
        if sel is not None:
            break
    if sel is None:
        sel = (128, 128)
        while tm > 16 and _step_bytes(tm, 128, 128) > budget:
            tm = _round_up(tm // 2, 16)
    tn, tk = sel

    m_tiles = pl.cdiv(M, tm)
    n_tiles = N_pad // tn
    k_tiles = K_pad // tk

    if m_tiles >= n_tiles:
        grid = (m_tiles, n_tiles, k_tiles)
        x_map = lambda i, j, k: (i, k)
        w_map = lambda i, j, k: (j, k)
        b_map = lambda i, j, k: (0, j)
        o_map = lambda i, j, k: (i, j)
    else:
        # N outermost: a dual-TensorCore (megacore) split of the leading
        # parallel axis lands on N, so each core streams half of the weight.
        grid = (n_tiles, m_tiles, k_tiles)
        x_map = lambda j, i, k: (i, k)
        w_map = lambda j, i, k: (j, k)
        b_map = lambda j, i, k: (0, j)
        o_map = lambda j, i, k: (i, j)

    if w_buf != 2:
        w_spec = pl.BlockSpec((tn, tk), w_map, pipeline_mode=pl.Buffered(w_buf))
    else:
        w_spec = pl.BlockSpec((tn, tk), w_map)

    kernel = functools.partial(_stdlinear_tiled_kernel, scale=scale)
    cost = pl.CostEstimate(
        flops=2 * M * N_pad * K_pad,
        transcendentals=0,
        # x re-read once per N tile, W re-read once per M tile, out written once.
        bytes_accessed=(n_tiles * M * K_pad * in_isz
                        + m_tiles * N_pad * K_pad * in_isz
                        + M * N_pad * out_isz
                        + N_pad * 4),
    )

    out = pl.pallas_call(
        kernel,
        out_shape=jax.ShapeDtypeStruct((M, N_pad), out_dtype),
        grid_spec=pltpu.PrefetchScalarGridSpec(
            num_scalar_prefetch=0,
            grid=grid,
            in_specs=[
                pl.BlockSpec((tm, tk), x_map),   # x row/K tile
                w_spec,                          # weight tile in native (N, K) layout
                pl.BlockSpec((1, tn), b_map),    # bias tile
            ],
            out_specs=pl.BlockSpec((tm, tn), o_map),
            scratch_shapes=[pltpu.VMEM((tm, tn), jnp.float32)],
        ),
        compiler_params=pltpu.CompilerParams(
            dimension_semantics=("parallel", "parallel", "arbitrary"),
            vmem_limit_bytes=vmem_limit,
        ),
        cost_estimate=cost,
    )(x2d, weight, bias2d)

    return out[:, :N].reshape(*lead_shape, N)


# ----------------------------------------------------------------------------
# Self-test
# ----------------------------------------------------------------------------
if __name__ == "__main__":
    key = jax.random.PRNGKey(0)

    def _ref(x, w, b):
        # Same bf16 cast as the kernel's compute path, f32 accumulation.
        acc = jnp.einsum(
            "...k,nk->...n",
            x.astype(jnp.bfloat16),
            w.astype(jnp.bfloat16),
            preferred_element_type=jnp.float32,
        )
        return (acc + b) / math.sqrt(x.shape[-1])

    # --- Test 1: module-consistent small shapes (weight-resident path) ---
    in_features, out_features = 32, 64
    k1, k2 = jax.random.split(key)
    x1 = jax.random.normal(k1, (2, 8, in_features), dtype=jnp.float32)
    w1 = jax.random.normal(k2, (out_features, in_features), dtype=jnp.float32)  # N(0,1) init
    b1 = jnp.zeros((out_features,), dtype=jnp.float32)                          # zeros init

    y1 = std_linear(x1, w1, b1)
    jax.block_until_ready(y1)
    assert y1.shape == (2, 8, out_features)
    assert jnp.allclose(y1, _ref(x1, w1, b1), atol=1e-3, rtol=1e-3)

    # --- Test 2: tiled path (multiple N and K tiles) with a ragged M block ---
    in2, out2 = 256, 384
    k3, k4 = jax.random.split(k2)
    x2 = jax.random.normal(k3, (2, 25, in2), dtype=jnp.float32)   # M = 50 (ragged vs tile)
    w2 = jax.random.normal(k4, (out2, in2), dtype=jnp.float32)
    b2 = jnp.zeros((out2,), dtype=jnp.float32)

    y2 = std_linear(x2, w2, b2, force_tiled=True, tn=128, tk=128)
    jax.block_until_ready(y2)
    assert y2.shape == (2, 25, out2)
    assert jnp.allclose(y2, _ref(x2, w2, b2), atol=1e-3, rtol=1e-3)

    print("KERNEL_OK")
</pallas_src>

<mosaic_0001>
module attributes {stable_mosaic.version = 11 : i64} {
  func.func @_stdlinear_resident_kernel(%arg0: i32, %arg1: memref<16x128xbf16, #tpu.memory_space<vmem>>, %arg2: memref<128x128xbf16, #tpu.memory_space<vmem>>, %arg3: memref<1x128xf32, #tpu.memory_space<vmem>>, %arg4: memref<16x128xf32, #tpu.memory_space<vmem>>) attributes {dimension_semantics = [#tpu.dimension_semantics<parallel>], iteration_bounds = array<i64: 1>, scalar_prefetch = 0 : i64, scratch_operands = 0 : i64, tpu.core_type = #tpu.core_type<tc>, window_params = [{transform_indices = @transform_0, window_bounds = array<i64: 16, 128>}, {pipeline_mode = #tpu.pipeline_mode<synchronous>, transform_indices = @transform_1, window_bounds = array<i64: 128, 128>}, {pipeline_mode = #tpu.pipeline_mode<synchronous>, transform_indices = @transform_2, window_bounds = array<i64: 1, 128>}, {transform_indices = @transform_3, window_bounds = array<i64: 16, 128>}]} {
    %c0 = arith.constant 0 : index
    %c0_0 = arith.constant 0 : index
    %0 = vector.load %arg1[%c0, %c0_0] : memref<16x128xbf16, #tpu.memory_space<vmem>>, vector<16x128xbf16>
    %c0_1 = arith.constant 0 : index
    %c0_2 = arith.constant 0 : index
    %1 = vector.load %arg2[%c0_1, %c0_2] : memref<128x128xbf16, #tpu.memory_space<vmem>>, vector<128x128xbf16>
    %cst = arith.constant dense<0.000000e+00> : vector<16x128xf32>
    %2 = tpu.matmul %0, %1, %cst {dimension_numbers = #tpu.dot_dimension_numbers<[1], [1], [0], [0], [0, 0, 1, 0], [], []>} : vector<16x128xbf16>, vector<128x128xbf16>, vector<16x128xf32> -> vector<16x128xf32>
    %c0_3 = arith.constant 0 : index
    %c0_4 = arith.constant 0 : index
    %3 = vector.load %arg3[%c0_3, %c0_4] : memref<1x128xf32, #tpu.memory_space<vmem>>, vector<1x128xf32>
    %4 = vector.broadcast %3 : vector<1x128xf32> to vector<16x128xf32>
    %5 = arith.addf %2, %4 : vector<16x128xf32>
    %cst_5 = arith.constant 0.176776692 : f32
    %6 = vector.broadcast %cst_5 : f32 to vector<16x128xf32>
    %7 = arith.mulf %5, %6 : vector<16x128xf32>
    %c0_6 = arith.constant 0 : index
    %c0_7 = arith.constant 0 : index
    %8 = vector.load %arg4[%c0_6, %c0_7] : memref<16x128xf32, #tpu.memory_space<vmem>>, vector<16x128xf32>
    tpu.vector_store %arg4[%c0_6, %c0_7], %7 {strides = array<i32>} : memref<16x128xf32, #tpu.memory_space<vmem>>, vector<16x128xf32>,
    return
  }
  func.func @transform_0(%arg0: i32) -> (i32, i32) {
    %c0_i32 = arith.constant 0 : i32
    %c0_i32_0 = arith.constant 0 : i32
    return %arg0, %c0_i32 : i32, i32
  }
  func.func @transform_1(%arg0: i32) -> (i32, i32) {
    %c0_i32 = arith.constant 0 : i32
    %c0_i32_0 = arith.constant 0 : i32
    %c0_i32_1 = arith.constant 0 : i32
    return %c0_i32, %c0_i32_0 : i32, i32
  }
  func.func @transform_2(%arg0: i32) -> (i32, i32) {
    %c0_i32 = arith.constant 0 : i32
    %c0_i32_0 = arith.constant 0 : i32
    %c0_i32_1 = arith.constant 0 : i32
    return %c0_i32, %c0_i32_0 : i32, i32
  }
  func.func @transform_3(%arg0: i32) -> (i32, i32) {
    %c0_i32 = arith.constant 0 : i32
    %c0_i32_0 = arith.constant 0 : i32
    return %arg0, %c0_i32 : i32, i32
  }
}

</mosaic_0001>

<bundles_post_ra>
// kernel: tpu_custom_call.1
= control target key start
LH: loop header
LB: loop body
LE: loop exit
PB: predicated region body
PF: predicated region fallthrough
CT: control target
= control target key end

     0   :  { %8 = vsyncpa [#allocation3], 0  ;;  %s383_s0 = inlined_call_operand.hbm [shape: bf16[16,128], index: 0, kind: input, shape index: {}]   ;;  %s384_s1 = inlined_call_operand.hbm [shape: bf16[128,128], index: 1, kind: input, shape index: {}]   ;;  %s385_s2 = inlined_call_operand.vmem [shape: f32[1,128], index: 2, kind: input, shape index: {}]   ;;  %s386_s3 = inlined_call_operand.hbm [shape: f32[16,128], index: 3, kind: output, shape index: {}]  }
   0x1   :  { %9 = vsyncpa [#allocation6], 0 }
   0x2   :  { %10 = vsyncpa [#allocation4], 0  ;;  %s315_s12 = smov [#allocation2]   ;;  %s243_s16 = scalar_lea.hbm %s383_s0, 128 }
   0x3   :  { %s16_s13 = sshll.u32 %s315_s12, 4  ;;  %p244_p0 = scmp.ne.s32.totalorder %s383_s0, %s243_s16  ;;  %s17_s13 = int_to_ptr.vmem [resolvable:$true] %s16_s13 }
   0x4   :  { %p247_p1 = scmp.lt.u32.totalorder %s243_s16, %s383_s0 }
   0x6   :  { %p249_p2 = pnand %p247_p1, %p244_p0 }
   0x8   :  { %252 = shalt.err (!%p249_p2)
}
   0x9   :  { %s253_s21 = scalar_lea.vmem %s17_s13, 128  ;;  %p258_p4 = scmp.lt.s32.totalorder %s17_s13, %s17_s13 }
   0xa   :  { %p254_p3 = scmp.ne.s32.totalorder %s17_s13, %s253_s21  ;;  %p259_p5 = scmp.lt.s32.totalorder %s253_s21, %s253_s21 }
   0xc   :  { %p260_p6 = por %p259_p5, %p258_p4 }
   0xe   :  { %p261_p7 = pnand %p260_p6, %p254_p3 }
  0x10   :  { %264 = shalt.err (!%p261_p7)
}
  0x11   :  { %s316_s22 = smov 64   ;;  %s317_s23 = smov 4  }
  0x12   :  { %22 = dma.hbm_to_vmem [thread:$0]  %s383_s0, 128, %s17_s13, [#allocation3], %s316_s22, %s316_s22, %s317_s23  }
  0x13   :  { %s318_s26 = smov [#allocation5]   ;;  %s265_s30 = scalar_lea.hbm %s384_s1, 1024 }
  0x14   :  { %s28_s27 = sshll.u32 %s318_s26, 4  ;;  %p266_p8 = scmp.ne.s32.totalorder %s384_s1, %s265_s30  ;;  %s29_s27 = int_to_ptr.vmem [resolvable:$true] %s28_s27 }
  0x15   :  { %p269_p9 = scmp.lt.u32.totalorder %s265_s30, %s384_s1 }
  0x17   :  { %p271_p10 = pnand %p269_p9, %p266_p8 }
  0x19   :  { %274 = shalt.err (!%p271_p10)
}
  0x1a   :  { %s275_s8 = scalar_lea.vmem %s29_s27, 1024  ;;  %p280_p12 = scmp.lt.s32.totalorder %s29_s27, %s29_s27 }
  0x1b   :  { %p276_p11 = scmp.ne.s32.totalorder %s29_s27, %s275_s8  ;;  %p281_p13 = scmp.lt.s32.totalorder %s275_s8, %s275_s8 }
  0x1d   :  { %p282_p0 = por %p281_p13, %p280_p12 }
  0x1f   :  { %p283_p1 = pnand %p282_p0, %p276_p11 }
  0x21   :  { %286 = shalt.err (!%p283_p1)
}
  0x22   :  { %34 = dma.hbm_to_vmem [thread:$0]  %s384_s1, 1024, %s29_s27, [#allocation6], %s316_s22, %s316_s22, %s317_s23  }
  0x23   :  { %309 = dma.done.wait [#allocation3], 128  }
  0x24   :  { %310 = vsyncadd [#allocation3], 4294967168 }
  0x25   :  { %311 = dma.done.wait [#allocation6], 1024  }
  0x26   :  { %312 = vsyncadd [#allocation6], 4294966272  ;;  %v319_v0 = vmov 0.0   ;;  %vm320_vm0 = vmmov 0   ;;  %v234_v1 = vld [vmem:[#allocation5] sm:$0xff]   ;;  %v235_v2 = vld [vmem:[#allocation5 + $0x8] sm:$0xff]  }
  0x27   :  { %205 = vmatprep.subr.bf16.mxu0 %v319_v0  ;;  %221 = vmatprep.mubr.msk.bf16.mxu0 %vm320_vm0, %v319_v0  ;;  %v236_v3 = vld [vmem:[#allocation5 + $0x10] sm:$0xff]   ;;  %v237_v4 = vld [vmem:[#allocation5 + $0x18] sm:$0xff]   ;;  %v238_v5 = vld [vmem:[#allocation5 + $0x20] sm:$0xff]   ;;  %s321_s11 = smov [#allocation7]  }
  0x28   :  { %206 = vmatpush3.bf16.xpose.msra.mxu0 %v234_v1  ;;  %v239_v6 = vld [vmem:[#allocation5 + $0x28] sm:$0xff]   ;;  %v240_v7 = vld [vmem:[#allocation5 + $0x30] sm:$0xff]   ;;  %v241_v8 = vld [vmem:[#allocation5 + $0x38] sm:$0xff]   ;;  %s173_s12 = sshll.u32 %s321_s11, 4  ;;  %s174_s12 = int_to_ptr.vmem [resolvable:$true] %s173_s12 }
  0x29   :  { %207 = vmatprep.subr.bf16.mxu0 %v319_v0  ;;  %v242_v9 = vld [vmem:[#allocation2] sm:$0xff]   ;;  %s287_s13 = scalar_lea.vmem %s174_s12, 256  ;;  %p292_p3 = scmp.lt.s32.totalorder %s174_s12, %s174_s12 }
  0x2a   :  { %v186_v10 = vld [vmem:[%s385_s2] ss:$0 sm:$0xff]  ;;  %p288_p2 = scmp.ne.s32.totalorder %s174_s12, %s287_s13  ;;  %p293_p4 = scmp.lt.s32.totalorder %s287_s13, %s287_s13 }
  0x2c   :  { %p294_p5 = por %p293_p4, %p292_p3 }
  0x2e   :  { %p295_p6 = pnand %p294_p5, %p288_p2 }
  0x30   :  { %208 = vmatpush3.bf16.xpose.msra.mxu0 %v235_v2 }
  0x31   :  { %209 = vmatprep.subr.bf16.mxu0 %v319_v0 }
  0x38   :  { %210 = vmatpush3.bf16.xpose.msra.mxu0 %v236_v3 }
  0x39   :  { %211 = vmatprep.subr.bf16.mxu0 %v319_v0 }
  0x40   :  { %212 = vmatpush3.bf16.xpose.msra.mxu0 %v237_v4 }
  0x41   :  { %213 = vmatprep.subr.bf16.mxu0 %v319_v0 }
  0x48   :  { %214 = vmatpush3.bf16.xpose.msra.mxu0 %v238_v5 }
  0x49   :  { %215 = vmatprep.subr.bf16.mxu0 %v319_v0 }
  0x50   :  { %216 = vmatpush3.bf16.xpose.msra.mxu0 %v239_v6 }
  0x51   :  { %217 = vmatprep.subr.bf16.mxu0 %v319_v0 }
  0x58   :  { %218 = vmatpush3.bf16.xpose.msra.mxu0 %v240_v7 }
  0x59   :  { %219 = vmatprep.subr.bf16.mxu0 %v319_v0 }
  0x60   :  { %220 = vmatpush3.bf16.xpose.msra.mxu0 %v241_v8 }
  0x67   :  { %222 = vmatmul.mubr.bf16.vlgmr.msra.gmra.mrb[0].mxu0 %v242_v9 }
 0x13a   :  { %v157_v11 = vpop.f32.mrb[0].mxu0 }
 0x13b   :  { %v158_v12 = vadd.f32 %v186_v10, %v157_v11  ;;  %v223_v13 = vpop.f32.mrb[1].mxu0 }
 0x13c   :  { %v160_v14 = vpop.f32.mrb[2].mxu0 }
 0x13d   :  { %v164_v15 = vmul.f32 0.17677669, %v158_v12  ;;  %v161_v16 = vadd.f32 %v186_v10, %v160_v14  ;;  %v224_v17 = vpop.f32.mrb[3].mxu0 }
 0x13f   :  { %166 = vst [vmem:[#allocation7] sm:$0xff] %v164_v15  ;;  %v165_v18 = vmul.f32 0.17677669, %v161_v16 }
 0x141   :  { %167 = vst [vmem:[#allocation7 + $0x8] sm:$0xff] %v165_v18 }
 0x142   :  { %298 = shalt.err (!%p295_p6)
}
 0x143   :  { %s299_s15 = scalar_lea.hbm %s386_s3, 256 }
 0x144   :  { %p300_p7 = scmp.ne.s32.totalorder %s386_s3, %s299_s15  ;;  %p303_p8 = scmp.lt.u32.totalorder %s299_s15, %s386_s3 }
 0x146   :  { %p305_p9 = pnand %p303_p8, %p300_p7 }
 0x148   :  { %308 = shalt.err (!%p305_p9)
}
 0x149   :  { %s322_s20 = smov 128   ;;  %s323_s21 = smov 8  }
 0x14a   :  { %179 = dma.vmem_to_hbm [thread:$0]  %s174_s12, 256, %s386_s3, [#allocation4], %s322_s20, %s322_s20, %s323_s21  }
 0x14b   :  { %313 = dma.done.wait [#allocation4], 256  }
 0x14c   :  { %314 = vsyncadd [#allocation4], 4294967040 }
 0x14d   :  { %183 = vsyncpa [#allocation3], 1 }
 0x14e   :  { %184 = vsyncpa [#allocation6], 1 }
 0x14f   :  { %185 = vsyncpa [#allocation4], 1 }

</bundles_post_ra>
